<compile_context>
chip_gen: v7x
topology: tpu7x:2x2x1
jax: 0.10.0
libtpu: 0.0.40
codegen_flags: <defaults>
</compile_context>

<pallas_src>
import numpy as np
import jax
import jax.numpy as jnp
from jax.experimental import pallas as pl
from jax.experimental.pallas import tpu as pltpu

# ---------------------------------------------------------------------------
# Problem sizes (consistent with the module: Linear(208, 1) =>
# 3 * 8 * 8 conv/pool features + 8 psl classes + 8 nn classes).
# ---------------------------------------------------------------------------
B = 2                       # image batch inside one evaluation
C_IN = 4                    # in_channels
H = W = 12                  # spatial -> conv output 10x10 (hence "avgpool_10x10")
OC = 3                      # conv out channels
KH = KW = 3
HO, WO = H - KH + 1, W - KW + 1      # 10, 10
POOL = 8                    # adaptive pool target (8, 8)
N_PRED = 5                  # psl_predictions.shape[0]
N_CLASSES = 8               # prediction width
FEAT = OC * POOL * POOL     # 192
FC_IN = FEAT + 2 * N_CLASSES         # 208
CKK = C_IN * KH * KW        # 36

LANE = B * HO * WO          # 200 im2col columns
LANE_PAD = 256              # padded lane dim (unmasked vregs, one clean MXU/VPU tile)
PRED_LANES = 8              # prediction index lanes (5 real + 3 pad)
PRED_ROWS = 24              # 16 fc-pred features + 1 ones(bias) row + 7 pad rows
WPRED_ROW0 = 40             # sublane-aligned offset of the fc-pred weights in the slab
WSLAB_ROWS = 64             # 36 W_fold rows + pad + 24 pred-weight rows


def adaptive_pool_matrix(in_size: int, out_size: int) -> jnp.ndarray:
    """Row-stochastic matrix implementing PyTorch AdaptiveAvgPool1d semantics."""
    P = np.zeros((out_size, in_size), dtype=np.float32)
    for i in range(out_size):
        start = (i * in_size) // out_size
        end = -((-(i + 1) * in_size) // out_size)   # ceil((i+1)*in/out)
        P[i, start:end] = 1.0 / (end - start)
    return jnp.asarray(P)


# ---------------------------------------------------------------------------
# Pallas kernel: one evaluation per grid step.
# ---------------------------------------------------------------------------
def moe_kernel(xcol_ref, pred_ref, wslab_ref, o_ref):
    # xcol_ref : (CKK, LANE_PAD)        im2col activations of this evaluation
    # pred_ref : (PRED_ROWS, PRED_LANES)  rows 0..15 = [psl|nn]^T, row 16 = ones
    # wslab_ref: (WSLAB_ROWS, LANE_PAD) packed weights (resident across grid)
    # o_ref    : (1, PRED_LANES)        sigmoid(logits), lanes 0..4 are real

    # conv + adaptive-pool + flatten + batch-mean + fc feature dot, all folded
    # into W_fold -> one VPU multiply + full reduction (no MXU needed here).
    w_fold = wslab_ref[0:CKK, :]                                   # (36, 256)
    s_feat = jnp.sum(xcol_ref[...] * w_fold, keepdims=True)        # (1, 1)

    # psl / nn part of the fc; the ones row of pred_ref carries the folded
    # fc-bias + conv-bias constant through the same reduction.
    wp = wslab_ref[WPRED_ROW0:WPRED_ROW0 + PRED_ROWS, 0:1]         # (24, 1)
    logits = jnp.sum(pred_ref[...] * wp, axis=0, keepdims=True) + s_feat   # (1, 8)

    # numerically stable sigmoid
    e = jnp.exp(-jnp.abs(logits))
    o_ref[...] = jnp.where(logits >= 0.0, 1.0 / (1.0 + e), e / (1.0 + e))


# ---------------------------------------------------------------------------
# Weight-only preprocessing: computed ONCE, reused across forward calls.
# ---------------------------------------------------------------------------
def prepare_weights(wconv, bconv, fc_w, fc_b, batch):
    oc, c, kh, kw = wconv.shape
    assert (oc, kh, kw) == (OC, KH, KW), "conv shape mismatch"
    assert fc_w.shape == (1, FC_IN), "fc must be Linear(208, 1)"
    assert batch == B, "pool/mean folding is specialized to the image batch size"
    ckk = c * kh * kw
    assert ckk == CKK

    wcol = wconv.reshape(oc, ckk).astype(jnp.float32)              # (OC, 36)
    ph = adaptive_pool_matrix(HO, POOL)                            # (8, 10)
    pw = adaptive_pool_matrix(WO, POOL)                            # (8, 10)
    wff = fc_w[0, :FEAT].reshape(oc, POOL, POOL).astype(jnp.float32)

    # pool + flatten + batch-mean + fc-feature dot folded onto conv outputs.
    m = jnp.einsum("pi,opq,qj->oij", ph, wff, pw)                  # (OC, 10, 10)
    mrep = jnp.tile(m.reshape(oc, HO * WO), (1, batch)) / batch    # (OC, 200)

    # ... then folded further onto the im2col activations (removes the matmul)
    w_fold = jnp.einsum("os,ok->ks", mrep, wcol)                   # (36, 200)
    bias_total = fc_b[0] + jnp.sum(mrep * bconv.reshape(oc, 1))    # conv bias + fc bias
    wpred = fc_w[0, FEAT:].astype(jnp.float32)                     # (16,)

    wslab = jnp.zeros((WSLAB_ROWS, LANE_PAD), jnp.float32)
    wslab = wslab.at[:CKK, :LANE].set(w_fold)                      # pad cols stay 0
    wslab = wslab.at[WPRED_ROW0:WPRED_ROW0 + 2 * N_CLASSES, 0].set(wpred)
    wslab = wslab.at[WPRED_ROW0 + 2 * N_CLASSES, 0].set(bias_total)
    return wslab


# ---------------------------------------------------------------------------
# Forward: E independent evaluations behind one pallas_call (grid=(E,)).
# ---------------------------------------------------------------------------
def moe_forward_batched(x, psl, nnp, wslab):
    e_n, b, c, h, w = x.shape
    ho, wo = h - KH + 1, w - KW + 1
    assert (b, c, ho, wo) == (B, C_IN, HO, WO)
    n_pred = psl.shape[1]
    assert n_pred == N_PRED and psl.shape[2] == N_CLASSES and nnp.shape == psl.shape

    # --- im2col, lane-padded to 256 (layout plumbing only; fused under jit) ---
    patches = [x[:, :, :, ki:ki + ho, kj:kj + wo]                  # (E, B, C, HO, WO)
               for ki in range(KH) for kj in range(KW)]
    xp = jnp.stack(patches, axis=3)                                # (E, B, C, KK, HO, WO)
    xcol = xp.transpose(0, 2, 3, 1, 4, 5).reshape(e_n, CKK, b * ho * wo)
    xcol = jnp.pad(xcol, ((0, 0), (0, 0), (0, LANE_PAD - b * ho * wo)))

    # --- prediction slab: rows 0..15 = [psl|nn]^T, row 16 = ones (bias carrier) ---
    pred = jnp.concatenate([psl, nnp], axis=2)                     # (E, 5, 16)
    predT = jnp.transpose(pred, (0, 2, 1))                         # (E, 16, 5)
    predT = jnp.pad(predT, ((0, 0), (0, 0), (0, PRED_LANES - n_pred)))
    ones_row = jnp.ones((e_n, 1, PRED_LANES), jnp.float32)
    pad_rows = jnp.zeros((e_n, PRED_ROWS - 2 * N_CLASSES - 1, PRED_LANES), jnp.float32)
    pred_slab = jnp.concatenate([predT, ones_row, pad_rows], axis=1)  # (E, 24, 8)

    out = pl.pallas_call(
        moe_kernel,
        out_shape=jax.ShapeDtypeStruct((e_n, 1, PRED_LANES), jnp.float32),
        grid=(e_n,),
        in_specs=[
            pl.BlockSpec((None, CKK, LANE_PAD), lambda i: (i, 0, 0)),
            pl.BlockSpec((None, PRED_ROWS, PRED_LANES), lambda i: (i, 0, 0)),
            pl.BlockSpec((WSLAB_ROWS, LANE_PAD), lambda i: (0, 0)),   # resident weights
        ],
        out_specs=pl.BlockSpec((None, 1, PRED_LANES), lambda i: (i, 0, 0)),
        compiler_params=pltpu.CompilerParams(
            dimension_semantics=("parallel",)),                    # shards over v7x TCs
    )(xcol.astype(jnp.float32), pred_slab.astype(jnp.float32), wslab)

    return out.reshape(e_n, PRED_LANES)[:, :n_pred, None]          # (E, N_PRED, 1)


def moe_forward(x, psl, nnp, wslab):
    """Module-equivalent single-evaluation forward: returns (N_PRED, 1)."""
    return moe_forward_batched(x[None], psl[None], nnp[None], wslab)[0]


# ---------------------------------------------------------------------------
# Pure-JAX reference (numerical sanity check of the kernel)
# ---------------------------------------------------------------------------
def moe_forward_ref(x, wconv, bconv, fc_w, fc_b, psl, nnp):
    conv = jax.lax.conv_general_dilated(
        x, wconv, window_strides=(1, 1), padding="VALID",
        dimension_numbers=("NCHW", "OIHW", "NCHW"),
    ) + bconv.reshape(1, OC, 1, 1)
    ph = adaptive_pool_matrix(HO, POOL)
    pw = adaptive_pool_matrix(WO, POOL)
    pooled = jnp.einsum("pi,bcij,qj->bcpq", ph, conv, pw)
    flat = pooled.reshape(x.shape[0], -1)                          # (B, 192)
    feat = jnp.mean(flat, axis=0, keepdims=True)                   # (1, 192)
    featN = jnp.repeat(feat, psl.shape[0], axis=0)                 # (N, 192)
    concat = jnp.concatenate([featN, psl, nnp], axis=1)            # (N, 208)
    logits = concat @ fc_w.T + fc_b                                # (N, 1)
    return jax.nn.sigmoid(logits)


# ---------------------------------------------------------------------------
# Main
# ---------------------------------------------------------------------------
if __name__ == "__main__":
    key = jax.random.PRNGKey(0)
    k_x, k_wc, k_bc, k_fw, k_fb, k_psl, k_nn = jax.random.split(key, 7)

    E = 8   # independent MoE evaluations batched behind one pallas_call

    # Deterministic synthetic parameters (shapes from the module __init__).
    x = jax.random.normal(k_x, (E, B, C_IN, H, W), jnp.float32)
    wconv = jax.random.normal(k_wc, (OC, C_IN, KH, KW), jnp.float32) * 0.1
    bconv = jax.random.normal(k_bc, (OC,), jnp.float32) * 0.1
    fc_w = jax.random.normal(k_fw, (1, FC_IN), jnp.float32) * 0.05
    fc_b = jax.random.normal(k_fb, (1,), jnp.float32) * 0.05
    psl = jax.nn.softmax(
        jax.random.normal(k_psl, (E, N_PRED, N_CLASSES), jnp.float32), axis=-1)
    nnp = jax.nn.softmax(
        jax.random.normal(k_nn, (E, N_PRED, N_CLASSES), jnp.float32), axis=-1)
    # TODO(synk): w_noise / softplus / Adam / fit() / compute_loss() are training-only
    # and unused in forward(); they are not implemented here.

    # Weight folding happens exactly once.
    wslab = prepare_weights(wconv, bconv, fc_w, fc_b, B)

    # Batched forward (whole wrapper jitted so the im2col / pred layout ops fuse).
    fwd = jax.jit(moe_forward_batched)
    out = jax.block_until_ready(fwd(x, psl, nnp, wslab))           # (E, 5, 1)

    ref = jax.vmap(
        lambda xe, pe, ne: moe_forward_ref(xe, wconv, bconv, fc_w, fc_b, pe, ne)
    )(x, psl, nnp)
    np.testing.assert_allclose(np.asarray(out), np.asarray(ref), rtol=1e-4, atol=2e-5)

    # Module-equivalent single-evaluation path (grid=(1,)).
    fwd1 = jax.jit(moe_forward)
    out1 = jax.block_until_ready(fwd1(x[0], psl[0], nnp[0], wslab))  # (5, 1)
    np.testing.assert_allclose(np.asarray(out1), np.asarray(ref[0]), rtol=1e-4, atol=2e-5)

    print("KERNEL_OK")
</pallas_src>

<mosaic_0001>
module attributes {stable_mosaic.version = 11 : i64} {
  func.func @moe_kernel(%arg0: i32, %arg1: memref<1x36x256xf32, #tpu.memory_space<vmem>>, %arg2: memref<1x24x8xf32, #tpu.memory_space<vmem>>, %arg3: memref<64x256xf32, #tpu.memory_space<vmem>>, %arg4: memref<1x1x8xf32, #tpu.memory_space<vmem>>) attributes {dimension_semantics = [#tpu.dimension_semantics<parallel>], iteration_bounds = array<i64: 8>, scalar_prefetch = 0 : i64, scratch_operands = 0 : i64, tpu.core_type = #tpu.core_type<tc>, window_params = [{transform_indices = @transform_0, window_bounds = array<i64: 1, 36, 256>}, {transform_indices = @transform_1, window_bounds = array<i64: 1, 24, 8>}, {pipeline_mode = #tpu.pipeline_mode<synchronous>, transform_indices = @transform_2, window_bounds = array<i64: 64, 256>}, {transform_indices = @transform_3, window_bounds = array<i64: 1, 1, 8>}]} {
    %c0 = arith.constant 0 : index
    %c0_0 = arith.constant 0 : index
    %0 = vector.load %arg3[%c0, %c0_0] : memref<64x256xf32, #tpu.memory_space<vmem>>, vector<36x256xf32>
    %c0_1 = arith.constant 0 : index
    %c0_2 = arith.constant 0 : index
    %c0_3 = arith.constant 0 : index
    %1 = vector.load %arg1[%c0_1, %c0_2, %c0_3] : memref<1x36x256xf32, #tpu.memory_space<vmem>>, vector<1x36x256xf32>
    %2 = vector.shape_cast %1 : vector<1x36x256xf32> to vector<36x256xf32>
    %3 = arith.mulf %2, %0 : vector<36x256xf32>
    %4 = vector.shape_cast %3 : vector<36x256xf32> to vector<1x36x256xf32>
    %cst = arith.constant dense<0.000000e+00> : vector<1xf32>
    %5 = vector.multi_reduction <add>, %4, %cst [1, 2] : vector<1x36x256xf32> to vector<1xf32>
    %6 = vector.shape_cast %5 : vector<1xf32> to vector<1x1x1xf32>
    %7 = vector.extract %6[0, 0, 0] : f32 from vector<1x1x1xf32>
    %8 = vector.broadcast %7 : f32 to vector<1x1xf32>
    %c40 = arith.constant 40 : index
    %c0_4 = arith.constant 0 : index
    %9 = vector.load %arg3[%c40, %c0_4] : memref<64x256xf32, #tpu.memory_space<vmem>>, vector<24x1xf32>
    %c0_5 = arith.constant 0 : index
    %c0_6 = arith.constant 0 : index
    %c0_7 = arith.constant 0 : index
    %10 = vector.load %arg2[%c0_5, %c0_6, %c0_7] : memref<1x24x8xf32, #tpu.memory_space<vmem>>, vector<1x24x8xf32>
    %11 = vector.shape_cast %10 : vector<1x24x8xf32> to vector<24x8xf32>
    %12 = vector.broadcast %9 : vector<24x1xf32> to vector<24x8xf32>
    %13 = arith.mulf %11, %12 : vector<24x8xf32>
    %cst_8 = arith.constant dense<0.000000e+00> : vector<8xf32>
    %14 = vector.multi_reduction <add>, %13, %cst_8 [0] : vector<24x8xf32> to vector<8xf32>
    %15 = vector.shape_cast %14 : vector<8xf32> to vector<1x8xf32>
    %16 = vector.broadcast %8 : vector<1x1xf32> to vector<1x8xf32>
    %17 = arith.addf %15, %16 : vector<1x8xf32>
    %18 = math.absf %17 : vector<1x8xf32>
    %cst_9 = arith.constant 0.000000e+00 : f32
    %19 = vector.broadcast %cst_9 : f32 to vector<1x8xf32>
    %20 = arith.subf %19, %18 : vector<1x8xf32>
    %21 = math.exp %20 : vector<1x8xf32>
    %cst_10 = arith.constant 0.000000e+00 : f32
    %22 = vector.broadcast %cst_10 : f32 to vector<1x8xf32>
    %23 = arith.cmpf oge, %17, %22 : vector<1x8xf32>
    %cst_11 = arith.constant 1.000000e+00 : f32
    %24 = vector.broadcast %cst_11 : f32 to vector<1x8xf32>
    %25 = arith.addf %24, %21 : vector<1x8xf32>
    %cst_12 = arith.constant 1.000000e+00 : f32
    %26 = vector.broadcast %cst_12 : f32 to vector<1x8xf32>
    %27 = arith.divf %26, %25 : vector<1x8xf32>
    %cst_13 = arith.constant 1.000000e+00 : f32
    %28 = vector.broadcast %cst_13 : f32 to vector<1x8xf32>
    %29 = arith.addf %28, %21 : vector<1x8xf32>
    %30 = arith.divf %21, %29 : vector<1x8xf32>
    %31 = arith.select %23, %27, %30 : vector<1x8xi1>, vector<1x8xf32>
    %c0_14 = arith.constant 0 : index
    %c0_15 = arith.constant 0 : index
    %c0_16 = arith.constant 0 : index
    %32 = vector.load %arg4[%c0_14, %c0_15, %c0_16] : memref<1x1x8xf32, #tpu.memory_space<vmem>>, vector<1x1x8xf32>
    %33 = vector.shape_cast %32 : vector<1x1x8xf32> to vector<1x8xf32>
    %34 = vector.shape_cast %31 : vector<1x8xf32> to vector<1x1x8xf32>
    tpu.vector_store %arg4[%c0_14, %c0_15, %c0_16], %34 {strides = array<i32>} : memref<1x1x8xf32, #tpu.memory_space<vmem>>, vector<1x1x8xf32>,
    return
  }
  func.func @transform_0(%arg0: i32) -> (i32, i32, i32) {
    %c0_i32 = arith.constant 0 : i32
    %c0_i32_0 = arith.constant 0 : i32
    %c0_i32_1 = arith.constant 0 : i32
    return %arg0, %c0_i32, %c0_i32_0 : i32, i32, i32
  }
  func.func @transform_1(%arg0: i32) -> (i32, i32, i32) {
    %c0_i32 = arith.constant 0 : i32
    %c0_i32_0 = arith.constant 0 : i32
    %c0_i32_1 = arith.constant 0 : i32
    return %arg0, %c0_i32, %c0_i32_0 : i32, i32, i32
  }
  func.func @transform_2(%arg0: i32) -> (i32, i32) {
    %c0_i32 = arith.constant 0 : i32
    %c0_i32_0 = arith.constant 0 : i32
    %c0_i32_1 = arith.constant 0 : i32
    return %c0_i32, %c0_i32_0 : i32, i32
  }
  func.func @transform_3(%arg0: i32) -> (i32, i32, i32) {
    %c0_i32 = arith.constant 0 : i32
    %c0_i32_0 = arith.constant 0 : i32
    %c0_i32_1 = arith.constant 0 : i32
    return %arg0, %c0_i32, %c0_i32_0 : i32, i32, i32
  }
}

</mosaic_0001>

<bundles_post_ra>
// kernel: moe_forward_batched.1
= control target key start
LH: loop header
LB: loop body
LE: loop exit
PB: predicated region body
PF: predicated region fallthrough
CT: control target
= control target key end

     0   :  { %s404_s12 = smov 0   ;;  %s468_s0 = inlined_call_operand.vmem [shape: f32[8,36,256], index: 0, kind: input, shape index: {}]   ;;  %s469_s1 = inlined_call_operand.vmem [shape: f32[8,24,8], index: 1, kind: input, shape index: {}]   ;;  %s470_s2 = inlined_call_operand.vmem [shape: f32[64,256], index: 2, kind: input, shape index: {}]   ;;  %s471_s3 = inlined_call_operand.vmem [shape: f32[8,1,8], index: 3, kind: output, shape index: {}]  }
   0x1 LB: > { %s347_s13 = sadd.s32 4294967295, %s381_s12   ;;  %p351_p0 = scmp.ge.s32.totalorder %s381_s12, 1  ;;  %s381_s12 = sphi %s404_s12, %s13_s12  }
   0x2   : > { %p147_p1 = scmp.lt.s32.totalorder %s381_s12, 9 }
   0x4   : > { %p148_p2 = pnand %p351_p0, %p147_p1 }
   0x5   : > { %p174_p3 = scmp.lt.s32.totalorder (!%p148_p2), %s347_s13, 7  ;;  %v383_v0 = vmov (!%p148_p2), 0   ;;  %v239_v1 = vld [vmem:[%s470_s2 + $0x60] sm:$0xff] (!%p148_p2)  ;;  %v188_v3 = vld [vmem:[%s470_s2 + $0x8] sm:$0xff] (!%p148_p2)  ;;  %v189_v4 = vld [vmem:[%s470_s2 + $0x10] sm:$0xff] (!%p148_p2)  ;;  %vm224_vm0 = vcmask (!%p148_p2), 1043456  }
   0x6   : > { %151 = sbr.rel (%p148_p2) target bundleno = 279 (0x117), region = 32  ;;  %370 = vset.pattern.permute.xlu1 (!%p148_p2), %v383_v0  ;;  %369 = vset.pattern.permute.xlu0 (!%p148_p2), %v383_v0  ;;  %v187_v2 = vld [vmem:[%s470_s2] sm:$0xff] (!%p148_p2)  ;;  %v240_v5 = vld [vmem:[%s470_s2 + $0x70] sm:$0xff] (!%p148_p2)  ;;  %v190_v6 = vld [vmem:[%s470_s2 + $0x18] sm:$0xff] (!%p148_p2)  ;;  %vm262_vm1 = vcmask (!%p148_p2), 64512   ;;  %vm286_vm2 = vcmask (!%p148_p2), 57344  }
   0x7   : > { %251 = vperm.xlu1 (!%p148_p2), %370, %v239_v1   ;;  %v191_v14 = vld [vmem:[%s470_s2 + $0x20] sm:$0xff] (!%p148_p2)  ;;  %v192_v18 = vld [vmem:[%s470_s2 + $0x28] sm:$0xff] (!%p148_p2)  ;;  %v193_v22 = vld [vmem:[%s470_s2 + $0x30] sm:$0xff] (!%p148_p2) }
   0x8   : > { %v195_v24 = vld [vmem:[%s470_s2 + $0x40] sm:$0xf] (!%p148_p2)  ;;  %v194_v28 = vld [vmem:[%s470_s2 + $0x38] sm:$0xff] (!%p148_p2)  ;;  %v196_v30 = vld [vmem:[%s470_s2 + $0x48] sm:$0xf] (!%p148_p2) }
   0x9   : > { %v238_v44 = vld [vmem:[%s470_s2 + $0x50] sm:$0xff] (!%p148_p2) }
   0xb   : > { %256 = vperm.xlu1 (!%p148_p2), %370, %v240_v5  }
   0xd   : > { %s473_s13 = smov (!%p174_p3, %s347_s13), 7 }
   0xe   : > { %s356_s16 = smul.u32 80, %s473_s13  ;;  %s186_s26 = scalar_lea.vmem %s471_s3, %s473_s13 }
   0xf   : > { %s357_s19 = smul.u32 24, %s473_s13 }
  0x10   : > { %s178_s27 = scalar_lea.vmem %s468_s0, %s356_s16 }
  0x11   : > { %v197_v7 = vld [vmem:[%s178_s27] sm:$0xff]  ;;  %v198_v8 = vld [vmem:[%s178_s27 + $0x8] sm:$0xff]  ;;  %v199_v9 = vld [vmem:[%s178_s27 + $0x10] sm:$0xff]  ;;  %s183_s22 = scalar_lea.vmem %s469_s1, %s357_s19 }
  0x12   : > { %v200_v10 = vld [vmem:[%s178_s27 + $0x18] sm:$0xff]  ;;  %v207_v11 = vmul.f32 %v197_v7, %v187_v2  ;;  %v208_v12 = vmul.f32 %v198_v8, %v188_v3  ;;  %v209_v13 = vmul.f32 %v199_v9, %v189_v4  ;;  %v201_v15 = vld [vmem:[%s178_s27 + $0x20] sm:$0xff]  ;;  %v202_v19 = vld [vmem:[%s178_s27 + $0x28] sm:$0xff] }
  0x13   : > { %v210_v16 = vmul.f32 %v200_v10, %v190_v6  ;;  %v211_v20 = vmul.f32 %v201_v15, %v191_v14  ;;  %v203_v23 = vld [vmem:[%s178_s27 + $0x30] sm:$0xff]  ;;  %v205_v25 = vld [vmem:[%s178_s27 + $0x40] sm:$0xf]  ;;  %v212_v26 = vmul.f32 %v202_v19, %v192_v18  ;;  %v204_v29 = vld [vmem:[%s178_s27 + $0x38] sm:$0xff] }
  0x14   : > { %v217_v17 = vadd.f32 %v208_v12, %v207_v11  ;;  %v206_v31 = vld [vmem:[%s178_s27 + $0x48] sm:$0xf]  ;;  %v213_v32 = vmul.f32 %v203_v23, %v193_v22  ;;  %v215_v34 = vmul.f32 %v205_v25, %v195_v24  ;;  %v214_v35 = vmul.f32 %v204_v29, %v194_v28  ;;  %v241_v54 = vld [vmem:[%s183_s22] sm:$0xff]  ;;  %v243_v59 = vld [vmem:[%s183_s22 + $0x10] sm:$0xff] }
  0x15   : > { %v216_v37 = vmul.f32 %v206_v31, %v196_v30  ;;  %v242_v53 = vld [vmem:[%s183_s22 + $0x8] sm:$0xff] }
  0x16   : > { %v218_v21 = vadd.f32 %v217_v17, %v209_v13  ;;  %v225_v39 = vsel %vm224_vm0, %v215_v34, 0.0 }
  0x17   : > { %v227_v41 = vsel %vm224_vm0, %v216_v37, 0.0 }
  0x18   : > { %v219_v27 = vadd.f32 %v218_v21, %v210_v16 }
  0x1a   : > { %v220_v33 = vadd.f32 %v219_v27, %v211_v20 }
  0x1c   : > { %v221_v36 = vadd.f32 %v220_v33, %v212_v26 }
  0x1e   : > { %v222_v38 = vadd.f32 %v221_v36, %v213_v32 }
  0x20   : > { %v223_v40 = vadd.f32 %v222_v38, %v214_v35 }
  0x22   : > { %v226_v42 = vadd.f32 %v225_v39, %v223_v40 }
  0x24   : > { %v228_v43 = vadd.f32 %v227_v41, %v226_v42 }
  0x26   : > { %229 = vadd.xlane.f32.xlu0 %v228_v43 }
  0x3c   : > { %246 = vperm.xlu0 %369, %v238_v44  }
  0x86   : > { %v252_v52 = vpop.permute.xlu1 %251 }
  0x87   : > { %v260_v56 = vmul.f32 %v252_v52, %v242_v53 }
  0x89   : > { %v264_v60 = vsel %vm262_vm1, %v260_v56, 0.0 }
  0x8a   : > { %v257_v58 = vpop.permute.xlu1 %256 }
  0x8b   : > { %v261_v62 = vmul.f32 %v257_v58, %v243_v59 }
  0x8d   : > { %v266_v0 = vsel %vm262_vm1, %v261_v62, 0.0 }
  0xb3   : > { %v230_v45 = vpop.xlane.xlu0 %229 }
  0xb4   : > { %v231_v46 = vrot.slane %v230_v45, 4 }
  0xb6   : > { %v232_v47 = vadd.f32 %v231_v46, %v230_v45 }
  0xb8   : > { %v233_v48 = vrot.slane %v232_v47, 2 }
  0xba   : > { %v234_v49 = vadd.f32 %v233_v48, %v232_v47 }
  0xbb   : > { %v247_v55 = vpop.permute.xlu0 %246 }
  0xbc   : > { %v235_v50 = vrot.slane %v234_v49, 1  ;;  %v259_v57 = vmul.f32 %v247_v55, %v241_v54 }
  0xbe   : > { %v236_v51 = vadd.f32 %v235_v50, %v234_v49  ;;  %v263_v61 = vsel %vm262_vm1, %v259_v57, 0.0 }
  0xbf   : > { %v265_v63 = vadd.f32 %v264_v60, %v263_v61 }
  0xc0   : > { %358 = vpush %v236_v51 }
  0xc1   : > { %v267_v1 = vadd.f32 %v266_v0, %v265_v63 }
  0xc3   : > { %v268_v2 = vrot.slane %v267_v1, 4 }
  0xc5   : > { %v269_v3 = vadd.f32 %v268_v2, %v267_v1 }
  0xc7   : > { %v270_v4 = vrot.slane %v269_v3, 2 }
  0xc9   : > { %v271_v5 = vadd.f32 %v270_v4, %v269_v3 }
  0xcb   : > { %v272_v6 = vrot.slane %v271_v5, 1 }
  0xcd   : > { %v273_v7 = vadd.f32 %v272_v6, %v271_v5 }
  0xf1   : > { %s359_s23 = spop %358 }
  0xf2   : > { %v274_v8 = vstv %s359_s23 }
  0xf3   : > { %v275_v9 = vadd.f32 %v274_v8, %v273_v7 }
  0xf5   : > { %v276_v10 = vand.u32 2147483647, %v275_v9  ;;  %vm280_vm3 = vcmp.ge.f32.partialorder %v275_v9, 0.0 }
  0xf7   : > { %v277_v11 = vsub.f32 0.0, %v276_v10 }
  0xf9   : > { %v278_v12 = vmul.f32 1.442695, %v277_v11 }
  0xfb   : > { %371 = vpow2.f32 %v278_v12 }
 0x105   : > { %v372_v13 = vpop.eup %371 }
 0x106   : > { %v281_v14 = vadd.f32 1.0, %v372_v13 }
 0x108   : > { %373 = vrcp.f32 %v281_v14 }
 0x112   : > { %v374_v15 = vpop.eup %373 }
 0x113   : > { %v284_v16 = vmul.f32 %v374_v15, %v372_v13 }
 0x115   : > { %v285_v17 = vsel %vm280_vm3, %v374_v15, %v284_v16 }
 0x116   : > { %287 = vst.msk [vmem:[%s186_s26] sm:$0x1] %vm286_vm2, %v285_v17 }
 0x117 PF: > { %s13_s12 = sadd.s32 1, %s381_s12  }
 0x118   : > { %p10_p4 = scmp.ge.s32.totalorder %s13_s12, 10  }
 0x11a   :  { %12 = sbr.rel (!%p10_p4) target bundleno = 1 (0x1), region = 65 }

</bundles_post_ra>
